<compile_context>
chip_gen: v6e
topology: v6e:2x2x1
jax: 0.10.0
libtpu: 0.0.40
codegen_flags: <defaults>
</compile_context>

<pallas_src>
import jax
import jax.numpy as jnp
from jax.experimental import pallas as pl
from jax.experimental.pallas import tpu as pltpu

F_IN = 85     # fc1 input width (logical, read directly, no padding pass)
H1 = 128      # fc1 output width
H2 = 64       # fc2 output width (logical)
H2_PAD = 128  # fc2 output width padded to a full 128-lane vreg
N_OUT = 2     # fc3 output width (narrow output block -> 64x less writeback)


def _round_up(x, m):
    return (x + m - 1) // m * m


def mlp_kernel(x_ref, w1_ref, b1_ref, w2_ref, b2_ref, w3_ref, b3_ref, o_ref):
    # fc1 + ReLU.  x block is (tb, 85) f32; cast to bf16 in-kernel.
    x = x_ref[...].astype(jnp.bfloat16)
    h1 = jnp.dot(x, w1_ref[...], preferred_element_type=jnp.float32)
    h1 = jnp.maximum(h1 + b1_ref[...], 0.0)
    # dropout(p=0.15) -> identity (inference semantics).
    # TODO(synk): training-mode dropout (pltpu.prng_random_bits mask) not emitted.
    # fc2 + ReLU.  H2 zero-padded 64 -> 128: padded columns are exactly 0
    # after ReLU and hit zero rows of w3, so the math is unchanged.
    h2 = jnp.dot(h1.astype(jnp.bfloat16), w2_ref[...],
                 preferred_element_type=jnp.float32)
    h2 = jnp.maximum(h2 + b2_ref[...], 0.0)
    # fc3 logits: narrow (tb, 2) result stored directly (64x fewer HBM bytes
    # than a lane-padded 128-wide store on this bandwidth-bound kernel).
    o = jnp.dot(h2.astype(jnp.bfloat16), w3_ref[...],
                preferred_element_type=jnp.float32) + b3_ref[...]
    o_ref[...] = o.astype(o_ref.dtype)


def _prepare_kernel_params(params):
    """Cast / zero-pad logical (in, out)-layout params to the kernel layout."""
    w1, b1, w2, b2, w3, b3 = params
    # Pad fc2 outputs 64 -> 128 (zero columns / zero bias entries).
    w2p = jnp.zeros((H1, H2_PAD), jnp.float32).at[:, :H2].set(w2)
    b2p = jnp.zeros((1, H2_PAD), jnp.float32).at[:, :H2].set(b2)
    # Pad fc3 inputs 64 -> 128 with zero rows (padded h2 columns are zero too).
    w3p = jnp.zeros((H2_PAD, N_OUT), jnp.float32).at[:H2, :].set(w3)
    # bf16 operands for the MXU; biases stay f32 (epilogue math is f32).
    return (w1.astype(jnp.bfloat16), b1,
            w2p.astype(jnp.bfloat16), b2p,
            w3p.astype(jnp.bfloat16), b3)


def net_forward(x, params, use_fc1=True, block_b=2048):
    """Pallas forward pass for Net.  x: [B, 85] float32.  Returns [B, 2] f32."""
    if not use_fc1:
        # TODO(synk): use_fc1=False path (x already width-128) not implemented.
        raise NotImplementedError("use_fc1=False path not implemented")

    w1, b1, w2, b2, w3, b3 = _prepare_kernel_params(params)

    B = x.shape[0]
    # Tile selection: aim for ~block_b rows/tile, keep >= 2 tiles when the
    # batch is large enough (v7x has 2 TensorCores), round the tile to the
    # 8-row sublane granule so the ragged last tile wastes < 8*n_tiles rows.
    n_tiles = max(pl.cdiv(B, block_b), 2 if B >= 16 else 1)
    tb = _round_up(pl.cdiv(B, n_tiles), 8)
    n_tiles = pl.cdiv(B, tb)   # Pallas masks the out-of-bounds tail writeback.
    grid = (n_tiles,)

    x_spec = pl.BlockSpec((tb, F_IN), lambda i: (i, 0))
    # Weights/biases: constant block index -> VMEM-resident across all tiles.
    resident = lambda shape: pl.BlockSpec(shape, lambda i: (0, 0))
    out_spec = pl.BlockSpec((tb, N_OUT), lambda i: (i, 0))

    flops = 2 * B * (F_IN * H1 + H1 * H2_PAD + H2_PAD * N_OUT)
    bytes_accessed = (
        B * F_IN * 4                                           # x (f32 read)
        + (F_IN * H1 + H1 * H2_PAD + H2_PAD * N_OUT) * 2       # weights (bf16)
        + (H1 + H2_PAD + N_OUT) * 4                            # biases (f32)
        + B * N_OUT * 4                                        # logits (f32)
    )

    out = pl.pallas_call(
        mlp_kernel,
        out_shape=jax.ShapeDtypeStruct((B, N_OUT), jnp.float32),
        grid_spec=pltpu.PrefetchScalarGridSpec(
            num_scalar_prefetch=0,
            grid=grid,
            in_specs=[
                x_spec,
                resident((F_IN, H1)), resident((1, H1)),
                resident((H1, H2_PAD)), resident((1, H2_PAD)),
                resident((H2_PAD, N_OUT)), resident((1, N_OUT)),
            ],
            out_specs=out_spec,
        ),
        compiler_params=pltpu.CompilerParams(
            dimension_semantics=("parallel",),
        ),
        cost_estimate=pl.CostEstimate(
            flops=flops, transcendentals=0, bytes_accessed=bytes_accessed),
    )(x, w1, b1, w2, b2, w3, b3)

    return out


def init_params(key):
    """Deterministic parameter init matching the nn.Linear shapes.

    PyTorch stores Linear weights as (out, in); we store the transpose
    (in, out) so the kernel computes x @ W.  Biases kept 2D (1, out).
    """
    k1, k2, k3, k4, k5, k6 = jax.random.split(key, 6)

    def uniform_init(k, shape, fan_in):
        bound = 1.0 / jnp.sqrt(fan_in)
        return jax.random.uniform(k, shape, jnp.float32, -bound, bound)

    w1 = uniform_init(k1, (F_IN, H1), 85.0)
    b1 = uniform_init(k2, (1, H1), 85.0)
    w2 = uniform_init(k3, (H1, H2), 128.0)
    b2 = uniform_init(k4, (1, H2), 128.0)
    w3 = uniform_init(k5, (H2, N_OUT), 64.0)
    b3 = uniform_init(k6, (1, N_OUT), 64.0)
    return (w1, b1, w2, b2, w3, b3)


def net_forward_ref(x, params):
    """Pure-JAX reference mirroring the kernel's bf16-operand / f32-accum math."""
    w1, b1, w2, b2, w3, b3 = params
    bf = lambda a: a.astype(jnp.bfloat16)
    dot = lambda a, b: jnp.dot(bf(a), bf(b), preferred_element_type=jnp.float32)
    h1 = jnp.maximum(dot(x, w1) + b1, 0.0)
    h2 = jnp.maximum(dot(h1, w2) + b2, 0.0)
    return dot(h2, w3) + b3


if __name__ == "__main__":
    key = jax.random.PRNGKey(0)
    kx, kp = jax.random.split(key)

    B = 8  # small batch
    x = jax.random.normal(kx, (B, F_IN), jnp.float32)
    params = init_params(kp)

    out = net_forward(x, params)
    out = jax.block_until_ready(out)

    ref = net_forward_ref(x, params)
    assert out.shape == (B, N_OUT), out.shape
    assert bool(jnp.all(jnp.isfinite(out))), "non-finite output"
    assert jnp.allclose(out, ref, atol=1e-2, rtol=1e-2), "mismatch vs reference"

    print("KERNEL_OK")
</pallas_src>

<mosaic_0001>
module attributes {stable_mosaic.version = 11 : i64} {
  func.func @mlp_kernel(%arg0: i32, %arg1: memref<8x85xf32, #tpu.memory_space<vmem>>, %arg2: memref<85x128xbf16, #tpu.memory_space<vmem>>, %arg3: memref<1x128xf32, #tpu.memory_space<vmem>>, %arg4: memref<128x128xbf16, #tpu.memory_space<vmem>>, %arg5: memref<1x128xf32, #tpu.memory_space<vmem>>, %arg6: memref<128x2xbf16, #tpu.memory_space<vmem>>, %arg7: memref<1x2xf32, #tpu.memory_space<vmem>>, %arg8: memref<8x2xf32, #tpu.memory_space<vmem>>) attributes {dimension_semantics = [#tpu.dimension_semantics<parallel>], iteration_bounds = array<i64: 1>, scalar_prefetch = 0 : i64, scratch_operands = 0 : i64, tpu.core_type = #tpu.core_type<tc>, window_params = [{transform_indices = @transform_0, window_bounds = array<i64: 8, 85>}, {pipeline_mode = #tpu.pipeline_mode<synchronous>, transform_indices = @transform_1, window_bounds = array<i64: 85, 128>}, {pipeline_mode = #tpu.pipeline_mode<synchronous>, transform_indices = @transform_2, window_bounds = array<i64: 1, 128>}, {pipeline_mode = #tpu.pipeline_mode<synchronous>, transform_indices = @transform_3, window_bounds = array<i64: 128, 128>}, {pipeline_mode = #tpu.pipeline_mode<synchronous>, transform_indices = @transform_4, window_bounds = array<i64: 1, 128>}, {pipeline_mode = #tpu.pipeline_mode<synchronous>, transform_indices = @transform_5, window_bounds = array<i64: 128, 2>}, {pipeline_mode = #tpu.pipeline_mode<synchronous>, transform_indices = @transform_6, window_bounds = array<i64: 1, 2>}, {transform_indices = @transform_7, window_bounds = array<i64: 8, 2>}]} {
    %c0 = arith.constant 0 : index
    %c0_0 = arith.constant 0 : index
    %0 = vector.load %arg1[%c0, %c0_0] : memref<8x85xf32, #tpu.memory_space<vmem>>, vector<8x85xf32>
    %1 = arith.truncf %0 : vector<8x85xf32> to vector<8x85xbf16>
    %c0_1 = arith.constant 0 : index
    %c0_2 = arith.constant 0 : index
    %2 = vector.load %arg2[%c0_1, %c0_2] : memref<85x128xbf16, #tpu.memory_space<vmem>>, vector<85x128xbf16>
    %cst = arith.constant dense<0.000000e+00> : vector<8x128xf32>
    %3 = tpu.matmul %1, %2, %cst {dimension_numbers = #tpu.dot_dimension_numbers<[1], [0], [0], [1], [0, 0, 1, 1], [], []>} : vector<8x85xbf16>, vector<85x128xbf16>, vector<8x128xf32> -> vector<8x128xf32>
    %c0_3 = arith.constant 0 : index
    %c0_4 = arith.constant 0 : index
    %4 = vector.load %arg3[%c0_3, %c0_4] : memref<1x128xf32, #tpu.memory_space<vmem>>, vector<1x128xf32>
    %5 = vector.broadcast %4 : vector<1x128xf32> to vector<8x128xf32>
    %6 = arith.addf %3, %5 : vector<8x128xf32>
    %cst_5 = arith.constant 0.000000e+00 : f32
    %7 = vector.broadcast %cst_5 : f32 to vector<8x128xf32>
    %8 = arith.maximumf %6, %7 : vector<8x128xf32>
    %9 = arith.truncf %8 : vector<8x128xf32> to vector<8x128xbf16>
    %c0_6 = arith.constant 0 : index
    %c0_7 = arith.constant 0 : index
    %10 = vector.load %arg4[%c0_6, %c0_7] : memref<128x128xbf16, #tpu.memory_space<vmem>>, vector<128x128xbf16>
    %cst_8 = arith.constant dense<0.000000e+00> : vector<8x128xf32>
    %11 = tpu.matmul %9, %10, %cst_8 {dimension_numbers = #tpu.dot_dimension_numbers<[1], [0], [0], [1], [0, 0, 1, 1], [], []>} : vector<8x128xbf16>, vector<128x128xbf16>, vector<8x128xf32> -> vector<8x128xf32>
    %c0_9 = arith.constant 0 : index
    %c0_10 = arith.constant 0 : index
    %12 = vector.load %arg5[%c0_9, %c0_10] : memref<1x128xf32, #tpu.memory_space<vmem>>, vector<1x128xf32>
    %13 = vector.broadcast %12 : vector<1x128xf32> to vector<8x128xf32>
    %14 = arith.addf %11, %13 : vector<8x128xf32>
    %cst_11 = arith.constant 0.000000e+00 : f32
    %15 = vector.broadcast %cst_11 : f32 to vector<8x128xf32>
    %16 = arith.maximumf %14, %15 : vector<8x128xf32>
    %17 = arith.truncf %16 : vector<8x128xf32> to vector<8x128xbf16>
    %c0_12 = arith.constant 0 : index
    %c0_13 = arith.constant 0 : index
    %18 = vector.load %arg6[%c0_12, %c0_13] : memref<128x2xbf16, #tpu.memory_space<vmem>>, vector<128x2xbf16>
    %cst_14 = arith.constant dense<0.000000e+00> : vector<8x2xf32>
    %19 = tpu.matmul %17, %18, %cst_14 {dimension_numbers = #tpu.dot_dimension_numbers<[1], [0], [0], [1], [0, 0, 1, 1], [], []>} : vector<8x128xbf16>, vector<128x2xbf16>, vector<8x2xf32> -> vector<8x2xf32>
    %c0_15 = arith.constant 0 : index
    %c0_16 = arith.constant 0 : index
    %20 = vector.load %arg7[%c0_15, %c0_16] : memref<1x2xf32, #tpu.memory_space<vmem>>, vector<1x2xf32>
    %21 = vector.broadcast %20 : vector<1x2xf32> to vector<8x2xf32>
    %22 = arith.addf %19, %21 : vector<8x2xf32>
    %c0_17 = arith.constant 0 : index
    %c0_18 = arith.constant 0 : index
    %23 = vector.load %arg8[%c0_17, %c0_18] : memref<8x2xf32, #tpu.memory_space<vmem>>, vector<8x2xf32>
    tpu.vector_store %arg8[%c0_17, %c0_18], %22 {strides = array<i32>} : memref<8x2xf32, #tpu.memory_space<vmem>>, vector<8x2xf32>,
    return
  }
  func.func @transform_0(%arg0: i32) -> (i32, i32) {
    %c0_i32 = arith.constant 0 : i32
    %c0_i32_0 = arith.constant 0 : i32
    return %arg0, %c0_i32 : i32, i32
  }
  func.func @transform_1(%arg0: i32) -> (i32, i32) {
    %c0_i32 = arith.constant 0 : i32
    %c0_i32_0 = arith.constant 0 : i32
    %c0_i32_1 = arith.constant 0 : i32
    return %c0_i32, %c0_i32_0 : i32, i32
  }
  func.func @transform_2(%arg0: i32) -> (i32, i32) {
    %c0_i32 = arith.constant 0 : i32
    %c0_i32_0 = arith.constant 0 : i32
    %c0_i32_1 = arith.constant 0 : i32
    return %c0_i32, %c0_i32_0 : i32, i32
  }
  func.func @transform_3(%arg0: i32) -> (i32, i32) {
    %c0_i32 = arith.constant 0 : i32
    %c0_i32_0 = arith.constant 0 : i32
    %c0_i32_1 = arith.constant 0 : i32
    return %c0_i32, %c0_i32_0 : i32, i32
  }
  func.func @transform_4(%arg0: i32) -> (i32, i32) {
    %c0_i32 = arith.constant 0 : i32
    %c0_i32_0 = arith.constant 0 : i32
    %c0_i32_1 = arith.constant 0 : i32
    return %c0_i32, %c0_i32_0 : i32, i32
  }
  func.func @transform_5(%arg0: i32) -> (i32, i32) {
    %c0_i32 = arith.constant 0 : i32
    %c0_i32_0 = arith.constant 0 : i32
    %c0_i32_1 = arith.constant 0 : i32
    return %c0_i32, %c0_i32_0 : i32, i32
  }
  func.func @transform_6(%arg0: i32) -> (i32, i32) {
    %c0_i32 = arith.constant 0 : i32
    %c0_i32_0 = arith.constant 0 : i32
    %c0_i32_1 = arith.constant 0 : i32
    return %c0_i32, %c0_i32_0 : i32, i32
  }
  func.func @transform_7(%arg0: i32) -> (i32, i32) {
    %c0_i32 = arith.constant 0 : i32
    %c0_i32_0 = arith.constant 0 : i32
    return %arg0, %c0_i32 : i32, i32
  }
}

</mosaic_0001>

<bundles_post_ra>
// kernel: tpu_custom_call.1
= control target key start
LH: loop header
LB: loop body
LE: loop exit
PB: predicated region body
PF: predicated region fallthrough
CT: control target
= control target key end

     0   :  { %12 = vsyncpa [#allocation3], 0  ;;  %s712_s0 = inlined_call_operand.hbm [shape: f32[8,85], index: 0, kind: input, shape index: {}]   ;;  %s713_s1 = inlined_call_operand.hbm [shape: bf16[85,128], index: 1, kind: input, shape index: {}]   ;;  %s714_s2 = inlined_call_operand.vmem [shape: f32[1,128], index: 2, kind: input, shape index: {}]   ;;  %s715_s3 = inlined_call_operand.vmem [shape: bf16[128,128], index: 3, kind: input, shape index: {}]   ;;  %s716_s4 = inlined_call_operand.vmem [shape: f32[1,128], index: 4, kind: input, shape index: {}]   ;;  %s717_s5 = inlined_call_operand.vmem [shape: bf16[128,2], index: 5, kind: input, shape index: {}]   ;;  %s718_s6 = inlined_call_operand.vmem [shape: f32[1,2], index: 6, kind: input, shape index: {}]   ;;  %s719_s7 = inlined_call_operand.vmem [shape: f32[8,2], index: 7, kind: output, shape index: {}]  }
   0x1   :  { %13 = vsyncpa [#allocation5], 0  ;;  %s571_s24 = smov [#allocation2]   ;;  %s572_s26 = smov [#allocation4]  }
   0x2   :  { %s20_s25 = sshll.u32 %s571_s24, 4  ;;  %s29_s27 = sshll.u32 %s572_s26, 4  ;;  %s21_s25 = int_to_ptr.vmem [resolvable:$true] %s20_s25  ;;  %s30_s27 = int_to_ptr.vmem [resolvable:$true] %s29_s27 }
   0x3   :  { %s535_s28 = scalar_lea.vmem %s21_s25, 128  ;;  %p540_p1 = scmp.lt.s32.totalorder %s21_s25, %s21_s25 }
   0x4   :  { %p536_p0 = scmp.ne.s32.totalorder %s21_s25, %s535_s28  ;;  %p541_p2 = scmp.lt.s32.totalorder %s535_s28, %s535_s28 }
   0x6   :  { %p542_p3 = por %p541_p2, %p540_p1 }
   0x8   :  { %p543_p4 = pnand %p542_p3, %p536_p0 }
   0xa   :  { %546 = shalt.err (!%p543_p4)
}
   0xb   :  { %23 = dma.hbm_to_vmem [thread:$0]  %s712_s0, 128, %s21_s25, [#allocation3]  }
   0xc   :  { %s555_s8 = scalar_lea.vmem %s30_s27, 704  ;;  %p560_p6 = scmp.lt.s32.totalorder %s30_s27, %s30_s27 }
   0xd   :  { %p556_p5 = scmp.ne.s32.totalorder %s30_s27, %s555_s8  ;;  %p561_p7 = scmp.lt.s32.totalorder %s555_s8, %s555_s8 }
   0xf   :  { %p562_p8 = por %p561_p7, %p560_p6 }
  0x11   :  { %p563_p9 = pnand %p562_p8, %p556_p5 }
  0x13   :  { %566 = shalt.err (!%p563_p9)
}
  0x14   :  { %s573_s9 = smov 64   ;;  %s574_s10 = smov 4  }
  0x15   :  { %35 = dma.hbm_to_vmem [thread:$0]  %s713_s1, 704, %s30_s27, [#allocation5], %s573_s9, %s573_s9, %s574_s10  }
  0x16   :  { %567 = dma.done.wait [#allocation3], 128  }
  0x17   :  { %568 = vsyncadd [#allocation3], 4294967168 }
  0x18   :  { %569 = dma.done.wait [#allocation5], 704  }
  0x19   :  { %570 = vsyncadd [#allocation5], 4294966592  ;;  %vm110_vm0 = vcmask 1041408   ;;  %v575_v0 = vmov 0.0   ;;  %vm576_vm1 = vmmov 0   ;;  %vm111_vm2 = vcmask 1042432  }
  0x1a   :  { %442 = vmatprep.subr.bf16.mxu0 %v575_v0  ;;  %458 = vmatprep.subr.bf16.mxu1 %v575_v0  ;;  %v577_v1 = vmov 65535   ;;  %v505_v4 = vld [vmem:[#allocation4 + $0x28] ss:$0 sps:$4 sm:$0x77]   ;;  %v506_v6 = vld [vmem:[#allocation4 + $0x20] sm:$0xff]   ;;  %v511_v7 = vld [vmem:[%s715_s3 + $0x38] sm:$0xff]  }
  0x1b   :  { %454 = vmatprep.mubr.msk.bf16.mxu0 %vm576_vm1, %v575_v0  ;;  %474 = vmatprep.mubr.msk.bf16.mxu1 %vm576_vm1, %v575_v0  ;;  %v112_v2 = vsel %vm110_vm0, 4294967295, %v577_v1  ;;  %v507_v8 = vld [vmem:[#allocation4 + $0x18] sm:$0xff]   ;;  %v512_v9 = vld [vmem:[%s715_s3 + $0x30] sm:$0xff]   ;;  %v508_v10 = vld [vmem:[#allocation4 + $0x10] sm:$0xff]   ;;  %vm106_vm3 = vcmask 695296   ;;  %vm383_vm4 = vcmask 15360  }
  0x1c   :  { %v113_v3 = vsel %vm111_vm2, %v112_v2, 0  ;;  %459 = vmatpush3.bf16.msra.mxu1 %v511_v7  ;;  %v513_v11 = vld [vmem:[%s715_s3 + $0x28] sm:$0xff]   ;;  %v509_v12 = vld [vmem:[#allocation4 + $0x8] sm:$0xff]   ;;  %v514_v13 = vld [vmem:[%s715_s3 + $0x20] sm:$0xff]  }
  0x1d   :  { %v115_v5 = vand.u32 %v505_v4, %v113_v3  ;;  %460 = vmatprep.subr.bf16.mxu1 %v575_v0  ;;  %v510_v14 = vld [vmem:[#allocation4] sm:$0xff]   ;;  %v53_v15 = vld [vmem:[#allocation2] sm:$0xff]  ;;  %v515_v16 = vld [vmem:[%s715_s3 + $0x18] sm:$0xff]  }
  0x1e   :  { %v54_v17 = vpack.c.bf16 %v53_v15, %v53_v15  ;;  %v516_v18 = vld [vmem:[%s715_s3 + $0x10] sm:$0xff]   ;;  %v517_v19 = vld [vmem:[%s715_s3 + $0x8] sm:$0xff]   ;;  %v518_v20 = vld [vmem:[%s715_s3] sm:$0xff]  }
  0x1f   :  { %443 = vmatpush3.bf16.msra.mxu0 %v115_v5  ;;  %v519_v21 = vld [vmem:[%s717_s5 + $0x38] sm:$0xff]   ;;  %v520_v22 = vld [vmem:[%s717_s5 + $0x30] sm:$0xff]   ;;  %v521_v23 = vld [vmem:[%s717_s5 + $0x28] sm:$0xff]  }
  0x20   :  { %444 = vmatprep.subr.bf16.mxu0 %v575_v0  ;;  %461 = vmatpush3.bf16.msra.mxu1 %v512_v9  ;;  %v522_v24 = vld [vmem:[%s717_s5 + $0x20] sm:$0xff]   ;;  %v523_v25 = vld [vmem:[%s717_s5 + $0x18] sm:$0xff]   ;;  %v524_v26 = vld [vmem:[%s717_s5 + $0x10] sm:$0xff]  }
  0x21   :  { %462 = vmatprep.subr.bf16.mxu1 %v575_v0  ;;  %v391_v27 = vld [vmem:[%s714_s2] ss:$0 sm:$0xff]  ;;  %v525_v35 = vld [vmem:[%s717_s5 + $0x8] sm:$0xff]  }
  0x22   :  { %v526_v36 = vld [vmem:[%s717_s5] sm:$0xff]  }
  0x23   :  { %445 = vmatpush3.bf16.msra.mxu0 %v506_v6  ;;  %v399_v37 = vld [vmem:[%s716_s4] ss:$0 sm:$0xff] }
  0x24   :  { %446 = vmatprep.subr.bf16.mxu0 %v575_v0  ;;  %463 = vmatpush3.bf16.msra.mxu1 %v513_v11  ;;  %v408_v45 = vld [vmem:[%s718_s6] ss:$0 sm:$0xff] }
  0x25   :  { %464 = vmatprep.subr.bf16.mxu1 %v575_v0 }
  0x27   :  { %447 = vmatpush3.bf16.msra.mxu0 %v507_v8 }
  0x28   :  { %448 = vmatprep.subr.bf16.mxu0 %v575_v0  ;;  %465 = vmatpush3.bf16.msra.mxu1 %v514_v13 }
  0x29   :  { %466 = vmatprep.subr.bf16.mxu1 %v575_v0 }
  0x2b   :  { %449 = vmatpush3.bf16.msra.mxu0 %v508_v10 }
  0x2c   :  { %450 = vmatprep.subr.bf16.mxu0 %v575_v0  ;;  %467 = vmatpush3.bf16.msra.mxu1 %v515_v16 }
  0x2d   :  { %468 = vmatprep.subr.bf16.mxu1 %v575_v0 }
  0x2f   :  { %451 = vmatpush3.bf16.msra.mxu0 %v509_v12 }
  0x30   :  { %452 = vmatprep.subr.bf16.mxu0 %v575_v0  ;;  %469 = vmatpush3.bf16.msra.mxu1 %v516_v18 }
  0x31   :  { %470 = vmatprep.subr.bf16.mxu1 %v575_v0 }
  0x33   :  { %453 = vmatpush3.bf16.msra.mxu0 %v510_v14 }
  0x34   :  { %478 = vmatprep.subr.bf16.mxu0 %v575_v0  ;;  %471 = vmatpush3.bf16.msra.mxu1 %v517_v19 }
  0x35   :  { %472 = vmatprep.subr.bf16.mxu1 %v575_v0 }
  0x36   :  { %455 = vmatmul.mubr.msk.bf16.vlgmr.msra.gmra.mxu0 %vm106_vm3, %v54_v17 }
  0x37   :  { %494 = vmatprep.mubr.msk.bf16.mxu0 %vm576_vm1, %v575_v0  ;;  %479 = vmatpush3.bf16.msra.mxu0 %v519_v21 }
  0x38   :  { %473 = vmatpush3.bf16.msra.mxu1 %v518_v20  ;;  %480 = vmatprep.subr.bf16.mxu0 %v575_v0 }
  0x3b   :  { %481 = vmatpush3.bf16.msra.mxu0 %v520_v22 }
  0x3c   :  { %482 = vmatprep.subr.bf16.mxu0 %v575_v0 }
  0x3f   :  { %483 = vmatpush3.bf16.msra.mxu0 %v521_v23 }
  0x40   :  { %484 = vmatprep.subr.bf16.mxu0 %v575_v0 }
  0x43   :  { %485 = vmatpush3.bf16.msra.mxu0 %v522_v24 }
  0x44   :  { %486 = vmatprep.subr.bf16.mxu0 %v575_v0 }
  0x47   :  { %487 = vmatpush3.bf16.msra.mxu0 %v523_v25 }
  0x48   :  { %488 = vmatprep.subr.bf16.mxu0 %v575_v0 }
  0x4b   :  { %489 = vmatpush3.bf16.msra.mxu0 %v524_v26 }
  0x4c   :  { %490 = vmatprep.subr.bf16.mxu0 %v575_v0 }
  0x4f   :  { %491 = vmatpush3.bf16.msra.mxu0 %v525_v35 }
  0x50   :  { %492 = vmatprep.subr.bf16.mxu0 %v575_v0 }
  0x53   :  { %493 = vmatpush3.bf16.msra.mxu0 %v526_v36 }
  0xf6   :  { %v151_v28 = vpop.f32.mrf.mxu0 }
  0xf7   :  { %v152_v29 = vadd.f32 %v391_v27, %v151_v28 }
  0xf8   :  { %v456_v30 = vpop.f32.mrf.mxu0 }
  0xf9   :  { %v157_v31 = vmax.f32 %v152_v29, 0.0 }
  0xfa   :  { %v154_v32 = vpop.f32.mrf.mxu0 }
  0xfb   :  { %v158_v33 = vpack.c.bf16 %v157_v31, %v157_v31 }
  0xfc   :  { %v457_v34 = vpop.f32.mrf.mxu0 }
  0xfd   :  { %475 = vmatmul.mubr.bf16.vlgmr.msra.gmra.mxu1 %v158_v33 }
 0x1bd   :  { %v264_v38 = vpop.f32.mrf.mxu1 }
 0x1be   :  { %v265_v39 = vadd.f32 %v399_v37, %v264_v38 }
 0x1bf   :  { %v476_v40 = vpop.f32.mrf.mxu1 }
 0x1c0   :  { %v270_v41 = vmax.f32 %v265_v39, 0.0 }
 0x1c1   :  { %v267_v42 = vpop.f32.mrf.mxu1 }
 0x1c2   :  { %v271_v43 = vpack.c.bf16 %v270_v41, %v270_v41 }
 0x1c3   :  { %v477_v44 = vpop.f32.mrf.mxu1 }
 0x1c4   :  { %495 = vmatmul.mubr.bf16.vlgmr.msra.gmra.mxu0 %v271_v43 }
 0x284   :  { %v377_v46 = vpop.f32.mrf.mxu0 }
 0x285   :  { %v378_v47 = vadd.f32 %v408_v45, %v377_v46 }
 0x286   :  { %v496_v48 = vpop.f32.mrf.mxu0 }
 0x287   :  { %384 = vst.msk [vmem:[%s719_s7] sm:$0xff] %vm383_vm4, %v378_v47 }
 0x288   :  { %v380_v49 = vpop.f32.mrf.mxu0 }
 0x28a   :  { %v497_v50 = vpop.f32.mrf.mxu0 }
 0x28b   :  { %389 = vsyncpa [#allocation3], 1 }
 0x28c   :  { %390 = vsyncpa [#allocation5], 1 }

</bundles_post_ra>
